<compile_context>
chip_gen: v5e
topology: v5e:2x2
jax: 0.10.0
libtpu: 0.0.40
codegen_flags: <defaults>
</compile_context>

<pallas_src>
import functools
import numpy as np

import jax
import jax.numpy as jnp
from jax import lax
from jax.experimental import pallas as pl
from jax.experimental.pallas import tpu as pltpu


_LANE = 128
_SUBLANE = 8
# Per-block byte budget in f32-equivalent terms (kernel upcasts the squared-sum
# path) including sublane padding for small C.  in + out, double-buffered, plus
# f32 temporaries stays ~4-6x this (<~12 MiB) -> safe on v5e/v6e/v7x defaults.
_BLOCK_BUDGET_BYTES = 2 * 1024 * 1024


def _round_up(n, m):
    return ((n + m - 1) // m) * m


# --------------------------------------------------------------------------
# Kernels
# --------------------------------------------------------------------------
def _pixel_norm_chan_sublane_kernel(x_ref, o_ref, *, eps):
    """Tile is (tb, C, ts): channels on the sublane axis, spatial on lanes."""
    x = x_ref[...]
    xf = x.astype(jnp.float32)                             # widen only the sum path
    ms = jnp.mean(xf * xf, axis=1, keepdims=True)          # (tb, 1, ts) sublane reduce
    inv = lax.rsqrt(ms + jnp.float32(eps))                 # EUP rsqrt
    o_ref[...] = (x * inv.astype(x.dtype)).astype(o_ref.dtype)


def _pixel_norm_chan_lane_kernel(x_ref, o_ref, *, eps):
    """Tile is (tb, C): channels on the lane axis (2-D latent input)."""
    x = x_ref[...]
    xf = x.astype(jnp.float32)
    ms = jnp.mean(xf * xf, axis=-1, keepdims=True)         # (tb, 1) cross-lane reduce
    inv = lax.rsqrt(ms + jnp.float32(eps))
    o_ref[...] = (x * inv.astype(x.dtype)).astype(o_ref.dtype)


# --------------------------------------------------------------------------
# Byte-budgeted tile selection (cdiv grids handle ragged last blocks; block
# dims stay (8,128)-legal: multiples of the tile, or equal to the full extent).
# --------------------------------------------------------------------------
def _choose_tiles_3d(B, C, S):
    # Lane (spatial) tile: full extent when small (always legal), otherwise a
    # large multiple of 128 so interior stores are unmasked and DMAs are big.
    if S <= 2048:
        ts = S
    else:
        ts = 2048
    c_pad = _round_up(C, _SUBLANE)          # small-C sublane padding counts
    ts_pad = _round_up(ts, _LANE)
    per_row = c_pad * ts_pad * 4            # f32-equivalent bytes per batch row
    tb = max(1, min(B, _BLOCK_BUDGET_BYTES // max(per_row, 1)))
    # v7x megacore: keep >= 2 parallel grid steps when the batch allows it.
    if tb >= B and pl.cdiv(S, ts) == 1 and B >= 2:
        tb = pl.cdiv(B, 2)
    return tb, ts


def _choose_tiles_2d(B, C):
    if B <= _SUBLANE:
        return B                            # full extent: always legal
    c_pad = _round_up(C, _LANE)
    tb = _BLOCK_BUDGET_BYTES // (c_pad * 4)
    tb = max(_SUBLANE, (tb // _SUBLANE) * _SUBLANE)      # multiple of 8
    tb = min(tb, _round_up(B, _SUBLANE))
    # v7x megacore: avoid a single-step grid for larger batches.
    if tb >= B and B > 2 * _SUBLANE:
        tb = _round_up(pl.cdiv(B, 2), _SUBLANE)
    return tb


# --------------------------------------------------------------------------
# Wrappers
# --------------------------------------------------------------------------
def _pixel_norm_3d(x3, eps):
    """x3: [B, C, S]; normalize over C (axis=1)."""
    B, C, S = x3.shape
    tb, ts = _choose_tiles_3d(B, C, S)
    kernel = functools.partial(_pixel_norm_chan_sublane_kernel, eps=eps)
    return pl.pallas_call(
        kernel,
        out_shape=jax.ShapeDtypeStruct((B, C, S), x3.dtype),
        grid_spec=pltpu.PrefetchScalarGridSpec(
            num_scalar_prefetch=0,
            grid=(pl.cdiv(B, tb), pl.cdiv(S, ts)),
            in_specs=[pl.BlockSpec((tb, C, ts), lambda b, s: (b, 0, s))],
            out_specs=pl.BlockSpec((tb, C, ts), lambda b, s: (b, 0, s)),
        ),
        compiler_params=pltpu.CompilerParams(
            dimension_semantics=("parallel", "parallel")),
    )(x3)


def _pixel_norm_2d(x2, eps):
    """x2: [B, C]; normalize over C (last, lane-dense axis)."""
    B, C = x2.shape
    tb = _choose_tiles_2d(B, C)
    kernel = functools.partial(_pixel_norm_chan_lane_kernel, eps=eps)
    return pl.pallas_call(
        kernel,
        out_shape=jax.ShapeDtypeStruct((B, C), x2.dtype),
        grid_spec=pltpu.PrefetchScalarGridSpec(
            num_scalar_prefetch=0,
            grid=(pl.cdiv(B, tb),),
            in_specs=[pl.BlockSpec((tb, C), lambda i: (i, 0))],
            out_specs=pl.BlockSpec((tb, C), lambda i: (i, 0)),
        ),
        compiler_params=pltpu.CompilerParams(
            dimension_semantics=("parallel",)),
    )(x2)


def pixel_norm(x, *, eps=1e-6):
    """PixelNorm: x / sqrt(mean(x**2, dim=1, keepdim=True) + eps)."""
    if x.ndim == 2:
        return _pixel_norm_2d(x, eps)
    # [B, C, *spatial] -> [B, C, S] (layout plumbing only; keeps lanes dense).
    B, C = int(x.shape[0]), int(x.shape[1])
    S = 1
    for d in x.shape[2:]:
        S *= int(d)
    y3 = _pixel_norm_3d(x.reshape(B, C, S), eps)
    return y3.reshape(x.shape)


# --------------------------------------------------------------------------
# Demo / self-check
# --------------------------------------------------------------------------
if __name__ == "__main__":
    key = jax.random.PRNGKey(0)
    k4, k2 = jax.random.split(key)

    # 4-D feature-map case: [B, C, H, W]
    x4 = jax.random.normal(k4, (2, 4, 16, 16), dtype=jnp.float32)
    y4 = jax.block_until_ready(pixel_norm(x4))
    y4_ref = x4 / jnp.sqrt(jnp.mean(x4 * x4, axis=1, keepdims=True) + 1e-6)
    np.testing.assert_allclose(np.asarray(y4), np.asarray(y4_ref),
                               rtol=1e-5, atol=1e-5)

    # 2-D latent case (mapping network): [B, C]
    x2 = jax.random.normal(k2, (8, 512), dtype=jnp.float32)
    y2 = jax.block_until_ready(pixel_norm(x2))
    y2_ref = x2 / jnp.sqrt(jnp.mean(x2 * x2, axis=1, keepdims=True) + 1e-6)
    np.testing.assert_allclose(np.asarray(y2), np.asarray(y2_ref),
                               rtol=1e-5, atol=1e-5)

    print("KERNEL_OK")
</pallas_src>

<mosaic_0001>
module attributes {stable_mosaic.version = 11 : i64} {
  func.func @_pixel_norm_chan_sublane_kernel(%arg0: i32, %arg1: i32, %arg2: memref<1x4x256xf32, #tpu.memory_space<vmem>>, %arg3: memref<1x4x256xf32, #tpu.memory_space<vmem>>) attributes {dimension_semantics = [#tpu.dimension_semantics<parallel>, #tpu.dimension_semantics<parallel>], iteration_bounds = array<i64: 2, 1>, scalar_prefetch = 0 : i64, scratch_operands = 0 : i64, tpu.core_type = #tpu.core_type<tc>, window_params = [{transform_indices = @transform_0, window_bounds = array<i64: 1, 4, 256>}, {transform_indices = @transform_1, window_bounds = array<i64: 1, 4, 256>}]} {
    %c0 = arith.constant 0 : index
    %c0_0 = arith.constant 0 : index
    %c0_1 = arith.constant 0 : index
    %0 = vector.load %arg2[%c0, %c0_0, %c0_1] : memref<1x4x256xf32, #tpu.memory_space<vmem>>, vector<1x4x256xf32>
    %1 = arith.mulf %0, %0 : vector<1x4x256xf32>
    %cst = arith.constant dense<0.000000e+00> : vector<1x256xf32>
    %2 = vector.multi_reduction <add>, %1, %cst [1] : vector<1x4x256xf32> to vector<1x256xf32>
    %3 = vector.shape_cast %2 : vector<1x256xf32> to vector<1x1x256xf32>
    %cst_2 = arith.constant 4.000000e+00 : f32
    %4 = vector.broadcast %cst_2 : f32 to vector<1x1x256xf32>
    %5 = arith.divf %3, %4 : vector<1x1x256xf32>
    %cst_3 = arith.constant 9.99999997E-7 : f32
    %6 = vector.broadcast %cst_3 : f32 to vector<1x1x256xf32>
    %7 = arith.addf %5, %6 : vector<1x1x256xf32>
    %8 = math.rsqrt %7 : vector<1x1x256xf32>
    %9 = vector.broadcast %8 : vector<1x1x256xf32> to vector<1x4x256xf32>
    %10 = arith.mulf %0, %9 : vector<1x4x256xf32>
    %c0_4 = arith.constant 0 : index
    %c0_5 = arith.constant 0 : index
    %c0_6 = arith.constant 0 : index
    %11 = vector.load %arg3[%c0_4, %c0_5, %c0_6] : memref<1x4x256xf32, #tpu.memory_space<vmem>>, vector<1x4x256xf32>
    tpu.vector_store %arg3[%c0_4, %c0_5, %c0_6], %10 {strides = array<i32>} : memref<1x4x256xf32, #tpu.memory_space<vmem>>, vector<1x4x256xf32>,
    return
  }
  func.func @transform_0(%arg0: i32, %arg1: i32) -> (i32, i32, i32) {
    %c0_i32 = arith.constant 0 : i32
    %c0_i32_0 = arith.constant 0 : i32
    return %arg0, %c0_i32, %arg1 : i32, i32, i32
  }
  func.func @transform_1(%arg0: i32, %arg1: i32) -> (i32, i32, i32) {
    %c0_i32 = arith.constant 0 : i32
    %c0_i32_0 = arith.constant 0 : i32
    return %arg0, %c0_i32, %arg1 : i32, i32, i32
  }
}

</mosaic_0001>

<bundles_post_ra>
// kernel: tpu_custom_call.1
= control target key start
LH: loop header
LB: loop body
LE: loop exit
PB: predicated region body
PF: predicated region fallthrough
CT: control target
= control target key end

     0   :  { %6 = vsyncpa [#allocation3], 0  ;;  %s657_s0 = inlined_call_operand.hbm [shape: f32[2,4,256], index: 0, kind: input, shape index: {}]   ;;  %s658_s1 = inlined_call_operand.hbm [shape: f32[2,4,256], index: 1, kind: output, shape index: {}]  }
   0x1   :  { %8 = vsyncpa [#allocation3 + $0x1], 0 }
   0x2   :  { %9 = vsyncpa [#allocation4], 0 }
   0x3   :  { %11 = vsyncpa [#allocation4 + $0x1], 0  ;;  %s530_s6 = smov 0   ;;  %s532_s7 = smov 0  }
   0x4   :  { %s534_s8 = smov 0   ;;  %s536_s9 = smov 0  }
   0x5   :  { %s538_s10 = smov 0   ;;  %s540_s11 = smov 0  }
   0x6 LB: > { %s319_s12 = sadd.s32 4294967295, %s517_s11   ;;  %s320_s13 = sadd.s32 4294967294, %s517_s11   ;;  %s517_s11 = sphi %s540_s11, %s17_s11   ;;  %s513_s10 = sphi %s538_s10, %s667_s10   ;;  %s509_s9 = sphi %s536_s9, %s666_s9   ;;  %s505_s8 = sphi %s534_s8, %s665_s8   ;;  %s501_s7 = sphi %s532_s7, %s664_s7   ;;  %s497_s6 = sphi %s530_s6, %s663_s6  }
   0x7   : > { %s29_s14 = sadd.s32 1, %s513_s10  ;;  %s38_s15 = sadd.s32 1, %s505_s8 }
   0x8   : > { %p31_p0 = scmp.ge.s32.totalorder %s29_s14, 2  ;;  %p45_p1 = scmp.ne.s32.totalorder %s505_s8, %s501_s7 }
   0x9   : > { %p46_p2 = scmp.eq.s32.totalorder %s517_s11, 0  ;;  %p51_p3 = scmp.ne.s32.totalorder %s501_s7, %s497_s6 }
   0xa   : > { %s669_s14 = smov (%p31_p0, %s29_s14), 0  ;;  %p52_p5 = scmp.eq.s32.totalorder %s319_s12, 0 }
   0xb   : > { %p571_p4 = por %p46_p2, %p45_p1  ;;  %s33_s17 = ssub.s32 %s513_s10, %s669_s14 }
   0xc   : > { %p77_p6 = scmp.eq.s32.totalorder %s319_s12, 1  ;;  %p36_p7 = scmp.eq.s32.totalorder %s33_s17, 0 }
   0xd   : > { %p577_p8 = por %p52_p5, %p51_p3  ;;  %p83_p10 = scmp.eq.s32.totalorder %s320_s13, 1 }
   0xe   : > { %p581_p9 = por %p77_p6, %p45_p1  ;;  %p322_p12 = scmp.ge.s32.totalorder %s517_s11, 2 }
   0xf   : > { %s586_s20 = scalar_select %p36_p7, %s505_s8, %s38_s15  }
  0x10   : > { %p588_p11 = por %p83_p10, %p51_p3  ;;  %p348_p13 = scmp.lt.s32.totalorder %s517_s11, 2 }
  0x11   : > { %s103_s22 = sand.u32 1, %s505_s8   ;;  %s334_s24 = sshll.u32 %s513_s10, 3 }
  0x12   : > { %s323_s23 = sshll.u32 %s103_s22, 3  ;;  %s114_s27 = scalar_lea.hbm %s657_s0, %s334_s24 }
  0x13   : > { %s107_s28 = scalar_lea.vmem [#allocation2], %s323_s23  ;;  %s116_s30 = sshll.u32 %s114_s27, 4  ;;  %s117_s30 = int_to_ptr.hbm [resolvable:$true] %s116_s30 }
  0x14   : > { %s118_s29 = sshll.u32 %s107_s28, 4  ;;  %p341_p0 = pnand %p348_p13, %p571_p4  ;;  %s119_s29 = int_to_ptr.vmem [resolvable:$true] %s118_s29 }
  0x15   : > { %p326_p1 = scmp.ge.s32.totalorder %s517_s11, 1  ;;  %p123_p2 = scmp.lt.s32.totalorder %s517_s11, 3 }
  0x16   : > { %s104_s2 = scalar_lea.sflag [#allocation3], %s103_s22 }
  0x17   : > { %343 = dma.hbm_to_vmem [thread:$0]  (!%p341_p0), %s117_s30, 128, %s119_s29, %s104_s2  }
  0x18   : > { %p124_p3 = pnand %p326_p1, %p123_p2 }
  0x19   : > { %s604_s3 = sand.u32 (!%p124_p3), 1, %s501_s7  }
  0x1a   : > { %127 = sbr.rel (%p124_p3) target bundleno = 87 (0x57), region = 24  ;;  %s327_s4 = sshll.u32 (!%p124_p3), %s604_s3, 3 }
  0x1b   : > { %s130_s5 = scalar_lea.sflag (!%p124_p3), [#allocation3], %s604_s3  ;;  %s133_s12 = scalar_lea.vmem (!%p124_p3), [#allocation2], %s327_s4 }
  0x1f   : > { %488 = dma.done.wait (%p577_p8), %s130_s5, 128  }
  0x20   : > { %490 = vsyncadd (%p577_p8), %s130_s5, 4294967168  ;;  %v519_v0 = vmov 4.0   ;;  %v155_v1 = vld [vmem:[%s133_s12] sm:$0xff]  ;;  %vm163_vm0 = vcmask 1043456   ;;  %s335_s13 = sshll.u32 %s509_s9, 3  ;;  %s152_s18 = scalar_lea.vmem [#allocation5], %s327_s4 }
  0x21   : > { %399 = vrcp.f32 %v519_v0  ;;  %v156_v2 = vmul.f32 %v155_v1, %v155_v1  ;;  %s230_s17 = scalar_lea.hbm %s658_s1, %s335_s13  ;;  %s232_s9 = sshll.u32 %s152_s18, 4  ;;  %s233_s9 = int_to_ptr.vmem [resolvable:$true] %s232_s9 }
  0x22   : > { %s234_s22 = sshll.u32 %s230_s17, 4  ;;  %s217_s23 = scalar_lea.sflag [#allocation4], %s604_s3  ;;  %s235_s22 = int_to_ptr.hbm [resolvable:$true] %s234_s22 }
  0x23   : > { %158 = vst [vmem:[#allocation1] ss:$2 sm:$0xff] %v156_v2  ;;  %s449_s24 = sshra.s32 %s235_s22, 4  ;;  %s455_s28 = scalar_lea.hbm %s658_s1, 16  ;;  %s450_s24 = int_to_ptr.hbm [resolvable:$true] %s449_s24 }
  0x24   : > { %s451_s25 = scalar_lea.hbm %s450_s24, 8  ;;  %p456_p7 = scmp.lt.s32.totalorder %s450_s24, %s658_s1 }
  0x25   : > { %p452_p4 = scmp.ne.s32.totalorder %s450_s24, %s451_s25  ;;  %p457_p8 = scmp.lt.s32.totalorder %s455_s28, %s451_s25 }
  0x27   : > { %v400_v3 = vpop.eup %399  ;;  %p453_p5 = pnand %p452_p4, %p581_p9  ;;  %p458_p10 = por %p457_p8, %p456_p7 }
  0x28   : > { %v179_v4 = vmul.f32 4.0, %v400_v3  ;;  %vm183_vm1 = vweird.f32 %v400_v3 }
  0x29   : > { %p454_p6 = pneg %p453_p5 }
  0x2a   : > { %v180_v5 = vsub.f32 1.0, %v179_v4  ;;  %v159_v6 = vld.sshfl [vmem:[#allocation1] sm:$0xff pattern:$0x75316420] }
  0x2b   : > { %v160_v7 = vld.sshfl [vmem:[#allocation1 + $0x8] sm:$0xff pattern:$0x75316420]  ;;  %v164_v8 = vsel %vm163_vm0, %v159_v6, 0.0  ;;  %p459_p13 = pnand %p458_p10, %p454_p6 }
  0x2c   : > { %v171_v9 = vsel %vm163_vm0, %v160_v7, 0.0  ;;  %v165_v10 = vrot.slane %v164_v8, 4  ;;  %v181_v12 = vmul.f32 %v400_v3, %v180_v5 }
  0x2d   : > { %v172_v11 = vrot.slane %v171_v9, 4 }
  0x2e   : > { %v166_v13 = vadd.f32 %v165_v10, %v164_v8  ;;  %v182_v17 = vadd.f32 %v400_v3, %v181_v12 }
  0x2f   : > { %v173_v14 = vadd.f32 %v172_v11, %v171_v9 }
  0x30   : > { %v167_v15 = vrot.slane %v166_v13, 2  ;;  %v184_v22 = vsel %vm183_vm1, %v400_v3, %v182_v17 }
  0x31   : > { %v174_v16 = vrot.slane %v173_v14, 2 }
  0x32   : > { %v168_v18 = vadd.f32 %v167_v15, %v166_v13 }
  0x33   : > { %v175_v19 = vadd.f32 %v174_v16, %v173_v14 }
  0x34   : > { %v169_v20 = vrot.slane %v168_v18, 1 }
  0x35   : > { %v176_v21 = vrot.slane %v175_v19, 1 }
  0x36   : > { %v170_v23 = vadd.f32 %v169_v20, %v168_v18 }
  0x37   : > { %v177_v24 = vadd.f32 %v176_v21, %v175_v19 }
  0x38   : > { %v185_v25 = vmul.f32 %v184_v22, %v170_v23 }
  0x39   : > { %v186_v26 = vmul.f32 %v184_v22, %v177_v24 }
  0x3a   : > { %v187_v27 = vadd.f32 1e-06, %v185_v25 }
  0x3b   : > { %v188_v28 = vadd.f32 1e-06, %v186_v26 }
  0x3c   : > { %401 = vrsqrt.f32 %v187_v27  ;;  %vm195_vm6 = vweird.f32 %v187_v27 }
  0x3d   : > { %403 = vrsqrt.f32 %v188_v28  ;;  %vm205_vm4 = vweird.f32 %v188_v28 }
  0x42   : > { %v402_v29 = vpop.eup %401 }
  0x43   : > { %v404_v30 = vpop.eup %403  ;;  %v190_v31 = vmul.f32 %v402_v29, %v187_v27  ;;  %vm196_vm3 = vweird.f32 %v402_v29 }
  0x44   : > { %v200_v32 = vmul.f32 %v404_v30, %v188_v28  ;;  %vm206_vm2 = vweird.f32 %v404_v30  ;;  %vm197_vm7 = vmor %vm195_vm6, %vm196_vm3 }
  0x45   : > { %v191_v33 = vmul.f32 %v402_v29, %v190_v31  ;;  %vm207_vm5 = vmor %vm205_vm4, %vm206_vm2 }
  0x46   : > { %v201_v34 = vmul.f32 %v404_v30, %v200_v32 }
  0x47   : > { %v192_v35 = vmul.f32 0.5, %v191_v33 }
  0x48   : > { %v202_v36 = vmul.f32 0.5, %v201_v34 }
  0x49   : > { %v193_v37 = vsub.f32 1.5, %v192_v35 }
  0x4a   : > { %v203_v38 = vsub.f32 1.5, %v202_v36 }
  0x4b   : > { %v194_v39 = vmul.f32 %v402_v29, %v193_v37 }
  0x4c   : > { %v204_v40 = vmul.f32 %v404_v30, %v203_v38 }
  0x4d   : > { %v198_v43 = vsel %vm197_vm7, %v402_v29, %v194_v39 }
  0x4e   : > { %v208_v41 = vsel %vm207_vm5, %v404_v30, %v204_v40 }
  0x4f   : > { %v211_v42 = vrot.slane %v208_v41, 4 }
  0x51   : > { %v212_v44 = vsel %vm163_vm0, %v198_v43, %v211_v42 }
  0x52   : > { %v214_v45 = vmul.f32 %v212_v44, %v155_v1 }
  0x54   : > { %215 = vst [vmem:[%s152_s18] sm:$0xff] %v214_v45 }
  0x55   : > { %462 = shalt.err (!%p459_p13)
}
  0x56   : > { %338 = dma.vmem_to_hbm [thread:$0]  (%p581_p9), %s233_s9, 128, %s235_s22, %s217_s23  }
  0x57 PF: > { %s246_s2 = sand.u32 1, %s497_s6   ;;  %p345_p0 = pnand %p322_p12, %p588_p11 }
  0x58   : > { %s247_s3 = scalar_lea.sflag [#allocation4], %s246_s2 }
  0x59   : > { %p346_p1 = pneg %p345_p0 }
  0x5b   : > { %492 = dma.done.wait (%p346_p1), %s247_s3, 128  }
  0x5c   : > { %494 = vsyncadd (%p346_p1), %s247_s3, 4294967168  ;;  %s17_s11 = sadd.s32 1, %s517_s11   ;;  %s663_s6 = smov %s501_s7 }
  0x5d   : > { %p14_p2 = scmp.ge.s32.totalorder %s17_s11, 4   ;;  %s664_s7 = smov %s505_s8 }
  0x5e   : > { %s665_s8 = smov %s586_s20  ;;  %s666_s9 = smov %s513_s10 }
  0x5f   : > { %s667_s10 = smov %s669_s14  ;;  %16 = sbr.rel (!%p14_p2) target bundleno = 6 (0x6), region = 69 }
  0x64   :  { %253 = vsyncpa [#allocation3], 1 }
  0x65   :  { %255 = vsyncpa [#allocation3 + $0x1], 1 }
  0x66   :  { %256 = vsyncpa [#allocation4], 1 }
  0x67   :  { %258 = vsyncpa [#allocation4 + $0x1], 1 }

</bundles_post_ra>
